<compile_context>
chip_gen: v5e
topology: v5e:2x2
jax: 0.10.0
libtpu: 0.0.40
codegen_flags: <defaults>
</compile_context>

<pallas_src>
import jax
import jax.numpy as jnp
from jax.experimental import pallas as pl
from jax.experimental.pallas import tpu as pltpu

_DEFAULT_COLS = 512                   # lane-dense last dim (multiple of 128)
_MIN_TILE_BYTES = 1 << 20             # 1 MiB floor per tile
_MAX_TILE_BYTES = 8 << 20             # 8 MiB cap per tile
_MULTISTEP_THRESHOLD_BYTES = 4 << 20  # above this, keep >= 4 grid steps (v7x megacore)


def _poly3_kernel(coef_ref, x_ref, o_ref):
    # coef_ref: SMEM f32[4] = [a, b, c, d]
    a = coef_ref[0]
    b = coef_ref[1]
    c = coef_ref[2]
    d = coef_ref[3]
    # Compute in f32 (mandatory on v5e which has no bf16 VPU); cast at store.
    x = x_ref[...].astype(jnp.float32)
    # Horner form: a + x*(b + x*(c + x*d))
    o_ref[...] = (a + x * (b + x * (c + x * d))).astype(o_ref.dtype)


def _vmem_capacity_bytes():
    try:
        return int(pltpu.get_tpu_info().vmem_capacity_bytes)
    except Exception:
        return 64 << 20  # conservative (v7x per-TC physical VMEM)


def _poly3_2d(x2d, coefs, *, vmem_bytes):
    """Run the Pallas kernel on a lane-dense (rows, cols) slab."""
    rows, cols = x2d.shape
    itemsize = jnp.dtype(x2d.dtype).itemsize

    # Tile budget ~ vmem/16 (4x double-buffered in+out stays well inside VMEM).
    tile_bytes = min(max(vmem_bytes // 16, _MIN_TILE_BYTES), _MAX_TILE_BYTES)
    block_rows = max(8, (tile_bytes // (cols * itemsize)) // 8 * 8)

    total_bytes = rows * cols * itemsize
    if total_bytes > _MULTISTEP_THRESHOLD_BYTES:
        # Keep at least 4 grid steps so the "parallel" axis can actually be
        # sharded across v7x's two TensorCores (harmless on 1-TC chips).
        block_rows = min(block_rows, max(8, (rows // 4) // 8 * 8))

    if block_rows >= rows:
        block_rows = rows  # full extent -> single grid step, no (8,128) issue

    grid = (pl.cdiv(rows, block_rows),)
    tile_actual = block_rows * cols * itemsize
    vmem_limit = int(min(vmem_bytes, 4 * tile_actual + (16 << 20)))

    return pl.pallas_call(
        _poly3_kernel,
        out_shape=jax.ShapeDtypeStruct((rows, cols), x2d.dtype),
        grid=grid,
        in_specs=[
            pl.BlockSpec(memory_space=pltpu.MemorySpace.SMEM),   # coefficients
            pl.BlockSpec((block_rows, cols), lambda i: (i, 0)),
        ],
        out_specs=pl.BlockSpec((block_rows, cols), lambda i: (i, 0)),
        compiler_params=pltpu.CompilerParams(
            dimension_semantics=("parallel",),
            vmem_limit_bytes=vmem_limit,
        ),
    )(coefs, x2d)


def polynomial3(x, a, b, c, d):
    """Elementwise y = a + b*x + c*x**2 + d*x**3 for x of any shape/dtype."""
    orig_shape = x.shape
    n = int(x.size)
    if n == 0:
        return x  # degenerate empty input

    coefs = jnp.stack([a, b, c, d]).astype(jnp.float32)
    vmem_bytes = _vmem_capacity_bytes()

    # Fast path: pick a lane-dense column count that divides n exactly, so the
    # reshape is free and there is no pad / output slice.
    cols = None
    for cand in (_DEFAULT_COLS, 1024, 256, 128):
        if n % cand == 0:
            cols = cand
            break

    if cols is not None:
        y2d = _poly3_2d(x.reshape(n // cols, cols), coefs, vmem_bytes=vmem_bytes)
        return y2d.reshape(orig_shape)

    # Ragged size: kernel over the 512-divisible bulk, plain jnp for the tiny
    # tail (< 512 elements) -- avoids a full-array pad + slice round trip.
    af, bf, cf, df = coefs[0], coefs[1], coefs[2], coefs[3]

    def _jnp_poly(v):
        v32 = v.astype(jnp.float32)
        return (af + v32 * (bf + v32 * (cf + v32 * df))).astype(x.dtype)

    cols = _DEFAULT_COLS
    bulk = (n // cols) * cols
    x_flat = x.reshape(-1)

    if bulk == 0:
        return _jnp_poly(x_flat).reshape(orig_shape)

    y_bulk = _poly3_2d(
        x_flat[:bulk].reshape(bulk // cols, cols), coefs, vmem_bytes=vmem_bytes
    ).reshape(-1)
    y_tail = _jnp_poly(x_flat[bulk:])
    return jnp.concatenate([y_bulk, y_tail]).reshape(orig_shape)


if __name__ == "__main__":
    key = jax.random.PRNGKey(0)
    kx, ka, kb, kc, kd, kx2 = jax.random.split(key, 6)

    # Deterministic "parameters" (torch.randn(()) equivalents)
    a = jax.random.normal(ka, (), dtype=jnp.float32)
    b = jax.random.normal(kb, (), dtype=jnp.float32)
    c = jax.random.normal(kc, (), dtype=jnp.float32)
    d = jax.random.normal(kd, (), dtype=jnp.float32)

    # Primary test: small input, divisible by 512 -> pure-kernel fast path.
    x = jax.random.normal(kx, (128, 256), dtype=jnp.float32)
    y = jax.block_until_ready(polynomial3(x, a, b, c, d))
    y_ref = a + b * x + c * x**2 + d * x**3
    assert y.shape == x.shape and y.dtype == x.dtype
    assert jnp.allclose(y, y_ref, atol=1e-5, rtol=1e-5), "mismatch vs reference"

    # Secondary test: ragged size -> kernel on bulk + jnp tail path.
    x2 = jax.random.normal(kx2, (3, 1000), dtype=jnp.float32)
    y2 = jax.block_until_ready(polynomial3(x2, a, b, c, d))
    y2_ref = a + b * x2 + c * x2**2 + d * x2**3
    assert y2.shape == x2.shape and y2.dtype == x2.dtype
    assert jnp.allclose(y2, y2_ref, atol=1e-5, rtol=1e-5), "mismatch vs reference (ragged)"

    print("KERNEL_OK")
</pallas_src>

<mosaic_0001>
module attributes {stable_mosaic.version = 11 : i64} {
  func.func @_poly3_kernel(%arg0: i32, %arg1: memref<4xf32, #tpu.memory_space<smem>>, %arg2: memref<64x512xf32, #tpu.memory_space<vmem>>, %arg3: memref<64x512xf32, #tpu.memory_space<vmem>>) attributes {dimension_semantics = [#tpu.dimension_semantics<parallel>], iteration_bounds = array<i64: 1>, scalar_prefetch = 0 : i64, scratch_operands = 0 : i64, tpu.core_type = #tpu.core_type<tc>, window_params = [{transform_indices = @transform_0, window_bounds = array<i64: 4>}, {transform_indices = @transform_1, window_bounds = array<i64: 64, 512>}, {transform_indices = @transform_2, window_bounds = array<i64: 64, 512>}]} {
    %c0 = arith.constant 0 : index
    %0 = memref.load %arg1[%c0] : memref<4xf32, #tpu.memory_space<smem>>
    %c1 = arith.constant 1 : index
    %1 = memref.load %arg1[%c1] : memref<4xf32, #tpu.memory_space<smem>>
    %c2 = arith.constant 2 : index
    %2 = memref.load %arg1[%c2] : memref<4xf32, #tpu.memory_space<smem>>
    %c3 = arith.constant 3 : index
    %3 = memref.load %arg1[%c3] : memref<4xf32, #tpu.memory_space<smem>>
    %c0_0 = arith.constant 0 : index
    %c0_1 = arith.constant 0 : index
    %4 = vector.load %arg2[%c0_0, %c0_1] : memref<64x512xf32, #tpu.memory_space<vmem>>, vector<64x512xf32>
    %5 = vector.broadcast %3 : f32 to vector<64x512xf32>
    %6 = arith.mulf %4, %5 : vector<64x512xf32>
    %7 = vector.broadcast %2 : f32 to vector<64x512xf32>
    %8 = arith.addf %7, %6 : vector<64x512xf32>
    %9 = arith.mulf %4, %8 : vector<64x512xf32>
    %10 = vector.broadcast %1 : f32 to vector<64x512xf32>
    %11 = arith.addf %10, %9 : vector<64x512xf32>
    %12 = arith.mulf %4, %11 : vector<64x512xf32>
    %13 = vector.broadcast %0 : f32 to vector<64x512xf32>
    %14 = arith.addf %13, %12 : vector<64x512xf32>
    %c0_2 = arith.constant 0 : index
    %c0_3 = arith.constant 0 : index
    %15 = vector.load %arg3[%c0_2, %c0_3] : memref<64x512xf32, #tpu.memory_space<vmem>>, vector<64x512xf32>
    tpu.vector_store %arg3[%c0_2, %c0_3], %14 {strides = array<i32>} : memref<64x512xf32, #tpu.memory_space<vmem>>, vector<64x512xf32>,
    return
  }
  func.func @transform_0(%arg0: i32) -> i32 {
    %c0_i32 = arith.constant 0 : i32
    %c0_i32_0 = arith.constant 0 : i32
    return %c0_i32 : i32
  }
  func.func @transform_1(%arg0: i32) -> (i32, i32) {
    %c0_i32 = arith.constant 0 : i32
    %c0_i32_0 = arith.constant 0 : i32
    return %arg0, %c0_i32 : i32, i32
  }
  func.func @transform_2(%arg0: i32) -> (i32, i32) {
    %c0_i32 = arith.constant 0 : i32
    %c0_i32_0 = arith.constant 0 : i32
    return %arg0, %c0_i32 : i32, i32
  }
}

</mosaic_0001>

<bundles_post_ra>
// kernel: tpu_custom_call.1
= control target key start
LH: loop header
LB: loop body
LE: loop exit
PB: predicated region body
PF: predicated region fallthrough
CT: control target
= control target key end

     0   :  { %7 = vsyncpa [#allocation5], 0  ;;  %s570_s0 = inlined_call_operand.hbm [shape: f32[4], index: 0, kind: input, shape index: {}]   ;;  %s571_s1 = inlined_call_operand.hbm [shape: f32[64,512], index: 1, kind: input, shape index: {}]   ;;  %s572_s2 = inlined_call_operand.hbm [shape: f32[64,512], index: 2, kind: output, shape index: {}]  }
   0x1   :  { %8 = vsyncpa [#allocation3], 0 }
   0x2   :  { %9 = vsyncpa [#allocation4], 0  ;;  %s15_s11 = sshll.u32 %s570_s0, 4  ;;  %s23_s14 = sshll.u32 %s571_s1, 4  ;;  %s16_s11 = int_to_ptr.hbm [resolvable:$true] %s15_s11  ;;  %s24_s14 = int_to_ptr.hbm [resolvable:$true] %s23_s14 }
   0x3   :  { %s399_s15 = smov [#allocation2]   ;;  %s400_s16 = smov [#allocation6]  }
   0x4   :  { %18 = dma.hbm_to_smem %s16_s11, 16, %s399_s15, [#allocation5]  }
   0x5   :  { %s25_s17 = sshll.u32 %s400_s16, 4  ;;  %s401_s18 = smov 512   ;;  %s26_s17 = int_to_ptr.vmem [resolvable:$true] %s25_s17 }
   0x6   :  { %s402_s19 = smov 32  }
   0x7   :  { %31 = dma.hbm_to_vmem [thread:$0]  %s24_s14, 4096, %s26_s17, [#allocation3], %s401_s18, %s401_s18, %s402_s19  }
   0x8   :  { %393 = dma.done.wait [#allocation5], 16  }
   0x9   :  { %394 = vsyncadd [#allocation5], 4294967280 }
   0xa   :  { %395 = dma.done.wait [#allocation3], 4096  }
   0xb   :  { %396 = vsyncadd [#allocation3], 4294963200 }
   0xc   :  { %40 = sfence }
   0xd   :  { %s41_s0 = sld [smem:[#allocation2]]  ;;  %v45_v0 = vld [vmem:[#allocation6] sm:$0xff]  ;;  %v46_v1 = vld [vmem:[#allocation6 + $0x8] sm:$0xff]  ;;  %v47_v2 = vld [vmem:[#allocation6 + $0x10] sm:$0xff]  ;;  %s403_s22 = smov [#allocation7]  }
   0xe   :  { %s325_s20 = sld [smem:[#allocation2 + $0x1]]  ;;  %v48_v3 = vld [vmem:[#allocation6 + $0x18] sm:$0xff]  ;;  %v49_v4 = vld [vmem:[#allocation6 + $0x20] sm:$0xff]  ;;  %v50_v5 = vld [vmem:[#allocation6 + $0x28] sm:$0xff]  ;;  %s309_s23 = sshll.u32 %s403_s22, 4  ;;  %s310_s23 = int_to_ptr.vmem [resolvable:$true] %s309_s23 }
   0xf   :  { %s326_s1 = sld [smem:[#allocation2 + $0x2]]  ;;  %v51_v6 = vld [vmem:[#allocation6 + $0x30] sm:$0xff]  ;;  %v52_v7 = vld [vmem:[#allocation6 + $0x38] sm:$0xff]  ;;  %v53_v48 = vld [vmem:[#allocation6 + $0x40] sm:$0xff]  ;;  %s311_s26 = sshll.u32 %s572_s2, 4  ;;  %s312_s26 = int_to_ptr.hbm [resolvable:$true] %s311_s26 }
  0x10   :  { %s327_s21 = sld [smem:[#allocation2 + $0x3]]  ;;  %v54_v49 = vld [vmem:[#allocation6 + $0x48] sm:$0xff]  ;;  %v55_v54 = vld [vmem:[#allocation6 + $0x50] sm:$0xff]  ;;  %v56_v55 = vld [vmem:[#allocation6 + $0x58] sm:$0xff] }
  0x11   :  { %v57_v56 = vld [vmem:[#allocation6 + $0x60] sm:$0xff]  ;;  %v58_v61 = vld [vmem:[#allocation6 + $0x68] sm:$0xff]  ;;  %v59_v62 = vld [vmem:[#allocation6 + $0x70] sm:$0xff] }
  0x12   :  { %v60_v63 = vld [vmem:[#allocation6 + $0x78] sm:$0xff] }
  0x13   :  { %v434_v11 = vstv %s41_s0 }
  0x14   :  { %v432_v10 = vstv %s325_s20 }
  0x15   :  { %v430_v9 = vstv %s326_s1 }
  0x16   :  { %v428_v8 = vstv %s327_s21 }
  0x17   :  { %v78_v12 = vmul.f32 %v428_v8, %v45_v0  ;;  %v79_v13 = vmul.f32 %v428_v8, %v46_v1  ;;  %v80_v14 = vmul.f32 %v428_v8, %v47_v2  ;;  %v81_v15 = vmul.f32 %v428_v8, %v48_v3 }
  0x18   :  { %v82_v16 = vmul.f32 %v428_v8, %v49_v4  ;;  %v83_v17 = vmul.f32 %v428_v8, %v50_v5  ;;  %v84_v18 = vmul.f32 %v428_v8, %v51_v6  ;;  %v85_v19 = vmul.f32 %v428_v8, %v52_v7 }
  0x19   :  { %v111_v20 = vadd.f32 %v430_v9, %v78_v12  ;;  %v112_v21 = vadd.f32 %v430_v9, %v79_v13  ;;  %v113_v22 = vadd.f32 %v430_v9, %v80_v14  ;;  %v114_v23 = vadd.f32 %v430_v9, %v81_v15 }
  0x1a   :  { %v115_v24 = vadd.f32 %v430_v9, %v82_v16  ;;  %v116_v25 = vadd.f32 %v430_v9, %v83_v17  ;;  %v117_v26 = vadd.f32 %v430_v9, %v84_v18  ;;  %v118_v27 = vadd.f32 %v430_v9, %v85_v19 }
  0x1b   :  { %v143_v28 = vmul.f32 %v111_v20, %v45_v0  ;;  %v144_v29 = vmul.f32 %v112_v21, %v46_v1  ;;  %v145_v30 = vmul.f32 %v113_v22, %v47_v2  ;;  %v146_v31 = vmul.f32 %v114_v23, %v48_v3 }
  0x1c   :  { %v147_v32 = vmul.f32 %v115_v24, %v49_v4  ;;  %v148_v33 = vmul.f32 %v116_v25, %v50_v5  ;;  %v149_v34 = vmul.f32 %v117_v26, %v51_v6  ;;  %v150_v35 = vmul.f32 %v118_v27, %v52_v7 }
  0x1d   :  { %v176_v36 = vadd.f32 %v432_v10, %v143_v28  ;;  %v177_v37 = vadd.f32 %v432_v10, %v144_v29  ;;  %v178_v38 = vadd.f32 %v432_v10, %v145_v30  ;;  %v179_v39 = vadd.f32 %v432_v10, %v146_v31 }
  0x1e   :  { %v180_v40 = vadd.f32 %v432_v10, %v147_v32  ;;  %v181_v41 = vadd.f32 %v432_v10, %v148_v33  ;;  %v182_v42 = vadd.f32 %v432_v10, %v149_v34  ;;  %v183_v43 = vadd.f32 %v432_v10, %v150_v35 }
  0x1f   :  { %v208_v44 = vmul.f32 %v176_v36, %v45_v0  ;;  %v209_v45 = vmul.f32 %v177_v37, %v46_v1  ;;  %v210_v46 = vmul.f32 %v178_v38, %v47_v2  ;;  %v211_v47 = vmul.f32 %v179_v39, %v48_v3 }
  0x20   :  { %v212_v50 = vmul.f32 %v180_v40, %v49_v4  ;;  %v213_v51 = vmul.f32 %v181_v41, %v50_v5  ;;  %v214_v52 = vmul.f32 %v182_v42, %v51_v6  ;;  %v215_v53 = vmul.f32 %v183_v43, %v52_v7 }
  0x21   :  { %v241_v57 = vadd.f32 %v434_v11, %v208_v44  ;;  %v242_v58 = vadd.f32 %v434_v11, %v209_v45  ;;  %v243_v59 = vadd.f32 %v434_v11, %v210_v46  ;;  %v244_v60 = vadd.f32 %v434_v11, %v211_v47  ;;  %v61_v44 = vld [vmem:[#allocation6 + $0x80] sm:$0xff]  ;;  %v62_v45 = vld [vmem:[#allocation6 + $0x88] sm:$0xff] }
  0x22   :  { %v245_v0 = vadd.f32 %v434_v11, %v212_v50  ;;  %v246_v1 = vadd.f32 %v434_v11, %v213_v51  ;;  %v247_v2 = vadd.f32 %v434_v11, %v214_v52  ;;  %v248_v3 = vadd.f32 %v434_v11, %v215_v53  ;;  %v63_v52 = vld [vmem:[#allocation6 + $0x90] sm:$0xff]  ;;  %v64_v53 = vld [vmem:[#allocation6 + $0x98] sm:$0xff] }
  0x23   :  { %273 = vst [vmem:[#allocation7] sm:$0xff] %v241_v57  ;;  %v86_v4 = vmul.f32 %v428_v8, %v53_v48  ;;  %v87_v5 = vmul.f32 %v428_v8, %v54_v49  ;;  %v88_v6 = vmul.f32 %v428_v8, %v55_v54  ;;  %v89_v7 = vmul.f32 %v428_v8, %v56_v55  ;;  %v65_v57 = vld [vmem:[#allocation6 + $0xa0] sm:$0xff] }
  0x24   :  { %274 = vst [vmem:[#allocation7 + $0x8] sm:$0xff] %v242_v58  ;;  %v90_v12 = vmul.f32 %v428_v8, %v57_v56  ;;  %v91_v13 = vmul.f32 %v428_v8, %v58_v61  ;;  %v92_v14 = vmul.f32 %v428_v8, %v59_v62  ;;  %v93_v15 = vmul.f32 %v428_v8, %v60_v63 }
  0x25   :  { %275 = vst [vmem:[#allocation7 + $0x10] sm:$0xff] %v243_v59  ;;  %v119_v16 = vadd.f32 %v430_v9, %v86_v4  ;;  %v120_v17 = vadd.f32 %v430_v9, %v87_v5  ;;  %v121_v18 = vadd.f32 %v430_v9, %v88_v6  ;;  %v122_v19 = vadd.f32 %v430_v9, %v89_v7 }
  0x26   :  { %276 = vst [vmem:[#allocation7 + $0x18] sm:$0xff] %v244_v60  ;;  %v123_v20 = vadd.f32 %v430_v9, %v90_v12  ;;  %v124_v21 = vadd.f32 %v430_v9, %v91_v13  ;;  %v125_v22 = vadd.f32 %v430_v9, %v92_v14  ;;  %v126_v23 = vadd.f32 %v430_v9, %v93_v15 }
  0x27   :  { %277 = vst [vmem:[#allocation7 + $0x20] sm:$0xff] %v245_v0  ;;  %v151_v24 = vmul.f32 %v119_v16, %v53_v48  ;;  %v152_v25 = vmul.f32 %v120_v17, %v54_v49  ;;  %v153_v26 = vmul.f32 %v121_v18, %v55_v54  ;;  %v154_v27 = vmul.f32 %v122_v19, %v56_v55 }
  0x28   :  { %278 = vst [vmem:[#allocation7 + $0x28] sm:$0xff] %v246_v1  ;;  %v155_v28 = vmul.f32 %v123_v20, %v57_v56  ;;  %v156_v29 = vmul.f32 %v124_v21, %v58_v61  ;;  %v157_v30 = vmul.f32 %v125_v22, %v59_v62  ;;  %v158_v31 = vmul.f32 %v126_v23, %v60_v63 }
  0x29   :  { %279 = vst [vmem:[#allocation7 + $0x30] sm:$0xff] %v247_v2  ;;  %v184_v32 = vadd.f32 %v432_v10, %v151_v24  ;;  %v185_v33 = vadd.f32 %v432_v10, %v152_v25  ;;  %v186_v34 = vadd.f32 %v432_v10, %v153_v26  ;;  %v187_v35 = vadd.f32 %v432_v10, %v154_v27 }
  0x2a   :  { %280 = vst [vmem:[#allocation7 + $0x38] sm:$0xff] %v248_v3  ;;  %v188_v36 = vadd.f32 %v432_v10, %v155_v28  ;;  %v189_v37 = vadd.f32 %v432_v10, %v156_v29  ;;  %v190_v38 = vadd.f32 %v432_v10, %v157_v30  ;;  %v191_v39 = vadd.f32 %v432_v10, %v158_v31 }
  0x2b   :  { %v216_v40 = vmul.f32 %v184_v32, %v53_v48  ;;  %v217_v41 = vmul.f32 %v185_v33, %v54_v49  ;;  %v218_v42 = vmul.f32 %v186_v34, %v55_v54  ;;  %v219_v43 = vmul.f32 %v187_v35, %v56_v55  ;;  %v66_v49 = vld [vmem:[#allocation6 + $0xa8] sm:$0xff]  ;;  %v67_v54 = vld [vmem:[#allocation6 + $0xb0] sm:$0xff]  ;;  %v68_v55 = vld [vmem:[#allocation6 + $0xb8] sm:$0xff] }
  0x2c   :  { %v220_v46 = vmul.f32 %v188_v36, %v57_v56  ;;  %v221_v47 = vmul.f32 %v189_v37, %v58_v61  ;;  %v222_v50 = vmul.f32 %v190_v38, %v59_v62  ;;  %v223_v51 = vmul.f32 %v191_v39, %v60_v63 }
  0x2d   :  { %v249_v58 = vadd.f32 %v434_v11, %v216_v40  ;;  %v250_v59 = vadd.f32 %v434_v11, %v217_v41  ;;  %v251_v60 = vadd.f32 %v434_v11, %v218_v42  ;;  %v252_v48 = vadd.f32 %v434_v11, %v219_v43  ;;  %v69_v40 = vld [vmem:[#allocation6 + $0xc0] sm:$0xff]  ;;  %v70_v41 = vld [vmem:[#allocation6 + $0xc8] sm:$0xff] }
  0x2e   :  { %v253_v0 = vadd.f32 %v434_v11, %v220_v46  ;;  %v254_v56 = vadd.f32 %v434_v11, %v221_v47  ;;  %v255_v61 = vadd.f32 %v434_v11, %v222_v50  ;;  %v256_v62 = vadd.f32 %v434_v11, %v223_v51  ;;  %v71_v50 = vld [vmem:[#allocation6 + $0xd0] sm:$0xff]  ;;  %v72_v51 = vld [vmem:[#allocation6 + $0xd8] sm:$0xff] }
  0x2f   :  { %281 = vst [vmem:[#allocation7 + $0x40] sm:$0xff] %v249_v58  ;;  %v94_v63 = vmul.f32 %v428_v8, %v61_v44  ;;  %v95_v1 = vmul.f32 %v428_v8, %v62_v45  ;;  %v96_v2 = vmul.f32 %v428_v8, %v63_v52  ;;  %v97_v3 = vmul.f32 %v428_v8, %v64_v53  ;;  %v73_v58 = vld [vmem:[#allocation6 + $0xe0] sm:$0xff] }
  0x30   :  { %282 = vst [vmem:[#allocation7 + $0x48] sm:$0xff] %v250_v59  ;;  %v98_v4 = vmul.f32 %v428_v8, %v65_v57  ;;  %v99_v5 = vmul.f32 %v428_v8, %v66_v49  ;;  %v100_v6 = vmul.f32 %v428_v8, %v67_v54  ;;  %v101_v7 = vmul.f32 %v428_v8, %v68_v55 }
  0x31   :  { %283 = vst [vmem:[#allocation7 + $0x50] sm:$0xff] %v251_v60  ;;  %v127_v12 = vadd.f32 %v430_v9, %v94_v63  ;;  %v128_v13 = vadd.f32 %v430_v9, %v95_v1  ;;  %v129_v14 = vadd.f32 %v430_v9, %v96_v2  ;;  %v130_v15 = vadd.f32 %v430_v9, %v97_v3 }
  0x32   :  { %284 = vst [vmem:[#allocation7 + $0x58] sm:$0xff] %v252_v48  ;;  %v131_v16 = vadd.f32 %v430_v9, %v98_v4  ;;  %v132_v17 = vadd.f32 %v430_v9, %v99_v5  ;;  %v133_v18 = vadd.f32 %v430_v9, %v100_v6  ;;  %v134_v19 = vadd.f32 %v430_v9, %v101_v7 }
  0x33   :  { %285 = vst [vmem:[#allocation7 + $0x60] sm:$0xff] %v253_v0  ;;  %v159_v20 = vmul.f32 %v127_v12, %v61_v44  ;;  %v160_v21 = vmul.f32 %v128_v13, %v62_v45  ;;  %v161_v22 = vmul.f32 %v129_v14, %v63_v52  ;;  %v162_v23 = vmul.f32 %v130_v15, %v64_v53 }
  0x34   :  { %286 = vst [vmem:[#allocation7 + $0x68] sm:$0xff] %v254_v56  ;;  %v163_v24 = vmul.f32 %v131_v16, %v65_v57  ;;  %v164_v25 = vmul.f32 %v132_v17, %v66_v49  ;;  %v165_v26 = vmul.f32 %v133_v18, %v67_v54  ;;  %v166_v27 = vmul.f32 %v134_v19, %v68_v55 }
  0x35   :  { %287 = vst [vmem:[#allocation7 + $0x70] sm:$0xff] %v255_v61  ;;  %v192_v28 = vadd.f32 %v432_v10, %v159_v20  ;;  %v193_v29 = vadd.f32 %v432_v10, %v160_v21  ;;  %v194_v30 = vadd.f32 %v432_v10, %v161_v22  ;;  %v195_v31 = vadd.f32 %v432_v10, %v162_v23 }
  0x36   :  { %288 = vst [vmem:[#allocation7 + $0x78] sm:$0xff] %v256_v62  ;;  %v196_v32 = vadd.f32 %v432_v10, %v163_v24  ;;  %v197_v33 = vadd.f32 %v432_v10, %v164_v25  ;;  %v198_v34 = vadd.f32 %v432_v10, %v165_v26  ;;  %v199_v35 = vadd.f32 %v432_v10, %v166_v27 }
  0x37   :  { %v224_v36 = vmul.f32 %v192_v28, %v61_v44  ;;  %v225_v37 = vmul.f32 %v193_v29, %v62_v45  ;;  %v226_v38 = vmul.f32 %v194_v30, %v63_v52  ;;  %v227_v39 = vmul.f32 %v195_v31, %v64_v53  ;;  %v74_v45 = vld [vmem:[#allocation6 + $0xe8] sm:$0xff]  ;;  %v75_v52 = vld [vmem:[#allocation6 + $0xf0] sm:$0xff]  ;;  %v76_v53 = vld [vmem:[#allocation6 + $0xf8] sm:$0xff] }
  0x38   :  { %v228_v42 = vmul.f32 %v196_v32, %v65_v57  ;;  %v229_v43 = vmul.f32 %v197_v33, %v66_v49  ;;  %v230_v46 = vmul.f32 %v198_v34, %v67_v54  ;;  %v231_v47 = vmul.f32 %v199_v35, %v68_v55 }
  0x39   :  { %v257_v59 = vadd.f32 %v434_v11, %v224_v36  ;;  %v258_v60 = vadd.f32 %v434_v11, %v225_v37  ;;  %v259_v48 = vadd.f32 %v434_v11, %v226_v38  ;;  %v260_v44 = vadd.f32 %v434_v11, %v227_v39 }
  0x3a   :  { %v261_v0 = vadd.f32 %v434_v11, %v228_v42  ;;  %v262_v57 = vadd.f32 %v434_v11, %v229_v43  ;;  %v263_v49 = vadd.f32 %v434_v11, %v230_v46  ;;  %v264_v54 = vadd.f32 %v434_v11, %v231_v47 }
  0x3b   :  { %289 = vst [vmem:[#allocation7 + $0x80] sm:$0xff] %v257_v59  ;;  %v102_v55 = vmul.f32 %v428_v8, %v69_v40  ;;  %v103_v56 = vmul.f32 %v428_v8, %v70_v41  ;;  %v104_v61 = vmul.f32 %v428_v8, %v71_v50  ;;  %v105_v62 = vmul.f32 %v428_v8, %v72_v51 }
  0x3c   :  { %290 = vst [vmem:[#allocation7 + $0x88] sm:$0xff] %v258_v60  ;;  %v106_v63 = vmul.f32 %v428_v8, %v73_v58  ;;  %v107_v1 = vmul.f32 %v428_v8, %v74_v45  ;;  %v108_v2 = vmul.f32 %v428_v8, %v75_v52  ;;  %v109_v3 = vmul.f32 %v428_v8, %v76_v53 }
  0x3d   :  { %291 = vst [vmem:[#allocation7 + $0x90] sm:$0xff] %v259_v48  ;;  %v135_v4 = vadd.f32 %v430_v9, %v102_v55  ;;  %v136_v5 = vadd.f32 %v430_v9, %v103_v56  ;;  %v137_v6 = vadd.f32 %v430_v9, %v104_v61  ;;  %v138_v7 = vadd.f32 %v430_v9, %v105_v62 }
  0x3e   :  { %292 = vst [vmem:[#allocation7 + $0x98] sm:$0xff] %v260_v44  ;;  %v139_v12 = vadd.f32 %v430_v9, %v106_v63  ;;  %v140_v13 = vadd.f32 %v430_v9, %v107_v1  ;;  %v141_v14 = vadd.f32 %v430_v9, %v108_v2  ;;  %v142_v15 = vadd.f32 %v430_v9, %v109_v3 }
  0x3f   :  { %293 = vst [vmem:[#allocation7 + $0xa0] sm:$0xff] %v261_v0  ;;  %v167_v8 = vmul.f32 %v135_v4, %v69_v40  ;;  %v168_v16 = vmul.f32 %v136_v5, %v70_v41  ;;  %v169_v17 = vmul.f32 %v137_v6, %v71_v50  ;;  %v170_v18 = vmul.f32 %v138_v7, %v72_v51 }
  0x40   :  { %294 = vst [vmem:[#allocation7 + $0xa8] sm:$0xff] %v262_v57  ;;  %v171_v19 = vmul.f32 %v139_v12, %v73_v58  ;;  %v172_v20 = vmul.f32 %v140_v13, %v74_v45  ;;  %v173_v21 = vmul.f32 %v141_v14, %v75_v52  ;;  %v174_v22 = vmul.f32 %v142_v15, %v76_v53 }
  0x41   :  { %295 = vst [vmem:[#allocation7 + $0xb0] sm:$0xff] %v263_v49  ;;  %v200_v23 = vadd.f32 %v432_v10, %v167_v8  ;;  %v201_v24 = vadd.f32 %v432_v10, %v168_v16  ;;  %v202_v25 = vadd.f32 %v432_v10, %v169_v17  ;;  %v203_v26 = vadd.f32 %v432_v10, %v170_v18 }
  0x42   :  { %296 = vst [vmem:[#allocation7 + $0xb8] sm:$0xff] %v264_v54  ;;  %v204_v9 = vadd.f32 %v432_v10, %v171_v19  ;;  %v205_v27 = vadd.f32 %v432_v10, %v172_v20  ;;  %v206_v28 = vadd.f32 %v432_v10, %v173_v21  ;;  %v207_v29 = vadd.f32 %v432_v10, %v174_v22 }
  0x43   :  { %v232_v30 = vmul.f32 %v200_v23, %v69_v40  ;;  %v233_v31 = vmul.f32 %v201_v24, %v70_v41  ;;  %v234_v32 = vmul.f32 %v202_v25, %v71_v50  ;;  %v235_v33 = vmul.f32 %v203_v26, %v72_v51 }
  0x44   :  { %v236_v34 = vmul.f32 %v204_v9, %v73_v58  ;;  %v237_v35 = vmul.f32 %v205_v27, %v74_v45  ;;  %v238_v39 = vmul.f32 %v206_v28, %v75_v52  ;;  %v239_v43 = vmul.f32 %v207_v29, %v76_v53 }
  0x45   :  { %v265_v36 = vadd.f32 %v434_v11, %v232_v30  ;;  %v266_v37 = vadd.f32 %v434_v11, %v233_v31  ;;  %v267_v38 = vadd.f32 %v434_v11, %v234_v32  ;;  %v268_v42 = vadd.f32 %v434_v11, %v235_v33 }
  0x46   :  { %v269_v46 = vadd.f32 %v434_v11, %v236_v34  ;;  %v270_v10 = vadd.f32 %v434_v11, %v237_v35  ;;  %v271_v40 = vadd.f32 %v434_v11, %v238_v39  ;;  %v272_v41 = vadd.f32 %v434_v11, %v239_v43 }
  0x47   :  { %297 = vst [vmem:[#allocation7 + $0xc0] sm:$0xff] %v265_v36 }
  0x48   :  { %298 = vst [vmem:[#allocation7 + $0xc8] sm:$0xff] %v266_v37 }
  0x49   :  { %299 = vst [vmem:[#allocation7 + $0xd0] sm:$0xff] %v267_v38 }
  0x4a   :  { %300 = vst [vmem:[#allocation7 + $0xd8] sm:$0xff] %v268_v42 }
  0x4b   :  { %301 = vst [vmem:[#allocation7 + $0xe0] sm:$0xff] %v269_v46 }
  0x4c   :  { %302 = vst [vmem:[#allocation7 + $0xe8] sm:$0xff] %v270_v10 }
  0x4d   :  { %303 = vst [vmem:[#allocation7 + $0xf0] sm:$0xff] %v271_v40 }
  0x4e   :  { %304 = vst [vmem:[#allocation7 + $0xf8] sm:$0xff] %v272_v41 }
  0x4f   :  { %317 = dma.vmem_to_hbm [thread:$0]  %s310_s23, 4096, %s312_s26, [#allocation4], %s401_s18, %s401_s18, %s402_s19  }
  0x50   :  { %397 = dma.done.wait [#allocation4], 4096  }
  0x51   :  { %398 = vsyncadd [#allocation4], 4294963200 }
  0x52   :  { %322 = vsyncpa [#allocation3], 1 }
  0x53   :  { %323 = vsyncpa [#allocation4], 1 }
  0x54   :  { %324 = vsyncpa [#allocation5], 1 }

</bundles_post_ra>
